<compile_context>
chip_gen: v5e
topology: v5e:2x2
jax: 0.10.0
libtpu: 0.0.40
codegen_flags: <defaults>
</compile_context>

<pallas_src>
import jax
import jax.numpy as jnp
from jax.experimental import pallas as pl
from jax.experimental.pallas import tpu as pltpu


def _round_up(x: int, m: int) -> int:
    return (x + m - 1) // m * m


# ----------------------------- kernels --------------------------------------


def _linear_kernel_direct(x_ref, wt_ref, b_ref, o_ref):
    """f32 output: accumulate directly into the resident output block."""
    k = pl.program_id(2)

    @pl.when(k == 0)
    def _init():
        # Fold the bias into the accumulator init.
        o_ref[...] = jnp.broadcast_to(b_ref[...].astype(o_ref.dtype), o_ref.shape)

    o_ref[...] += jnp.dot(
        x_ref[...], wt_ref[...], preferred_element_type=jnp.float32
    )


def _linear_kernel_acc(x_ref, wt_ref, b_ref, o_ref, acc_ref):
    """Narrow output: keep an f32 VMEM accumulator, cast on the last K step."""
    k = pl.program_id(2)

    @pl.when(k == 0)
    def _init():
        acc_ref[...] = jnp.broadcast_to(
            b_ref[...].astype(jnp.float32), acc_ref.shape
        )

    acc_ref[...] += jnp.dot(
        x_ref[...], wt_ref[...], preferred_element_type=jnp.float32
    )

    @pl.when(k == pl.num_programs(2) - 1)
    def _finalize():
        o_ref[...] = acc_ref[...].astype(o_ref.dtype)


# ----------------------------- tiling ---------------------------------------

_TM_CAP = 512
_TN_CAP = 512
_TK_CAP_F32 = 1024
_TK_CAP_BF16 = 2048


def _fc_tiles(F: int, C: int, itemsize: int):
    """Batch-independent (tn, tk) choice, lane-dense and MXU friendly."""
    tk_cap = _TK_CAP_F32 if itemsize >= 4 else _TK_CAP_BF16
    tn = min(_TN_CAP, _round_up(C, 128))
    tk = min(tk_cap, _round_up(F, 128))
    return tn, tk


# ----------------------- one-time parameter prep ----------------------------


def prepare_basic_head(weight, bias, compute_dtype=None):
    """One-time (per-model) transpose + pad of the fc parameters.

    weight: (num_classes, in_features) PyTorch layout; bias: (num_classes,).
    The transpose/pad copies are hoisted here so the forward path does not
    re-issue them (and re-stream the weight) every call.
    """
    C, F = weight.shape
    w_dtype = jnp.dtype(compute_dtype) if compute_dtype is not None else weight.dtype
    tn, tk = _fc_tiles(F, C, jnp.dtype(w_dtype).itemsize)
    F_pad, C_pad = _round_up(F, tk), _round_up(C, tn)

    wt = jnp.transpose(weight)                                  # (F, C)
    if (F_pad, C_pad) != (F, C):
        wt = jnp.pad(wt, ((0, F_pad - F), (0, C_pad - C)))
    if wt.dtype != w_dtype:
        wt = wt.astype(w_dtype)

    b = bias.reshape(1, C)
    if C_pad != C:
        b = jnp.pad(b, ((0, 0), (0, C_pad - C)))

    return dict(wt=wt, b=b, F=F, C=C, tn=tn, tk=tk, compute_dtype=w_dtype)


# ----------------------------- forward --------------------------------------


def _basic_head_pallas(x, params, tiles=None):
    B, F = x.shape
    assert F == params["F"], "in_features mismatch"
    C = params["C"]
    wt_p = params["wt"]          # (F_pad, C_pad), pre-transposed, pre-padded
    b_p = params["b"]            # (1, C_pad)
    F_pad, C_pad = wt_p.shape
    cdt = jnp.dtype(params["compute_dtype"])
    itemsize = cdt.itemsize
    sub = 8 if itemsize >= 4 else 16       # sublane packing (bf16 packs 16)

    if tiles is not None:
        tm, tn, tk = tiles
    else:
        tn, tk = params["tn"], params["tk"]
        tm = min(_TM_CAP, _round_up(B, sub))
        # v7x has 2 TensorCores sharded over the parallel axes: if the grid
        # would be (1, 1, K), split a parallel axis when the problem allows.
        if _round_up(B, tm) // tm == 1 and C_pad // tn == 1:
            if B >= 2 * sub:
                tm = _round_up((B + 1) // 2, sub)
            elif tn >= 256:
                tn //= 2
    assert F_pad % tk == 0 and C_pad % tn == 0, "tiles must divide padded dims"

    B_pad = _round_up(B, tm)
    x_p = x
    if (B_pad, F_pad) != (B, F):
        x_p = jnp.pad(x, ((0, B_pad - B), (0, F_pad - F)))
    if x_p.dtype != cdt:
        x_p = x_p.astype(cdt)

    out_dtype = x.dtype
    direct = jnp.dtype(out_dtype) == jnp.dtype(jnp.float32)
    kernel = _linear_kernel_direct if direct else _linear_kernel_acc
    scratch = [] if direct else [pltpu.VMEM((tm, tn), jnp.float32)]

    grid = (B_pad // tm, C_pad // tn, F_pad // tk)

    out_itemsize = jnp.dtype(out_dtype).itemsize
    flops = 2 * B_pad * F_pad * C_pad
    bytes_accessed = (
        x_p.size * x_p.dtype.itemsize * (C_pad // tn)        # x re-read per N tile
        + wt_p.size * wt_p.dtype.itemsize * (B_pad // tm)    # W re-read per M tile
        + b_p.size * b_p.dtype.itemsize * (B_pad // tm)
        + B_pad * C_pad * out_itemsize
    )

    out_p = pl.pallas_call(
        kernel,
        out_shape=jax.ShapeDtypeStruct((B_pad, C_pad), out_dtype),
        grid_spec=pltpu.PrefetchScalarGridSpec(
            num_scalar_prefetch=0,
            grid=grid,
            in_specs=[
                pl.BlockSpec((tm, tk), lambda i, j, k: (i, k)),   # x
                pl.BlockSpec((tk, tn), lambda i, j, k: (k, j)),   # W^T
                pl.BlockSpec((1, tn), lambda i, j, k: (0, j)),    # bias
            ],
            out_specs=pl.BlockSpec((tm, tn), lambda i, j, k: (i, j)),
            scratch_shapes=scratch,
        ),
        compiler_params=pltpu.CompilerParams(
            dimension_semantics=("parallel", "parallel", "arbitrary"),
            # Large tiles exceed the default scoped VMEM limit; 48 MiB leaves
            # headroom under v7x's 64 MiB physical and is trivial on v5e/v6e.
            vmem_limit_bytes=48 << 20,
        ),
        cost_estimate=pl.CostEstimate(
            flops=flops, transcendentals=0, bytes_accessed=bytes_accessed
        ),
    )(x_p, wt_p, b_p)

    if (B_pad, C_pad) != (B, C):
        out_p = out_p[:B, :C]
    return out_p


def basic_head_forward(x, weight=None, bias=None, *, params=None,
                       force_pallas=False, tiles=None, compute_dtype=None):
    """Pallas equivalent of BasicHead.forward (a single nn.Linear).

    Either pass (weight, bias) in PyTorch layout, or (preferred) a `params`
    dict produced once by `prepare_basic_head` so the weight transpose/pad
    copies are not repeated every call.
    """
    B, F = x.shape
    if params is None:
        assert weight is not None and bias is not None
        C = weight.shape[0]
        if not force_pallas and (B * F * C) < (1 << 20):
            # Tiny head: pallas_call launch + per-step overhead dominates.
            return (jnp.dot(x, weight.T, preferred_element_type=jnp.float32)
                    + bias).astype(x.dtype)
        params = prepare_basic_head(weight, bias, compute_dtype=compute_dtype)
    return _basic_head_pallas(x, params, tiles=tiles)


def init_basic_head_params(key, in_features, num_classes, dtype=jnp.float32):
    """PyTorch-style init: U(-1/sqrt(in_features), +1/sqrt(in_features))."""
    kw, kb = jax.random.split(key)
    bound = float(in_features) ** -0.5
    weight = jax.random.uniform(
        kw, (num_classes, in_features), dtype=dtype, minval=-bound, maxval=bound
    )
    bias = jax.random.uniform(
        kb, (num_classes,), dtype=dtype, minval=-bound, maxval=bound
    )
    return weight, bias


if __name__ == "__main__":
    key = jax.random.PRNGKey(0)
    k_x, k_p = jax.random.split(key)

    batch = 8
    in_features = 192
    num_classes = 16

    x = jax.random.normal(k_x, (batch, in_features), dtype=jnp.float32)
    weight, bias = init_basic_head_params(k_p, in_features, num_classes)

    # One-time parameter prep (weight transpose + pad hoisted out of forward).
    params = prepare_basic_head(weight, bias)

    # 1) Force the Pallas path with small K-tiles so the demo exercises a
    #    multi-step reduction (F_pad = 256, tk = 128 -> 2 K steps) and the
    #    direct-into-output f32 accumulation.
    out = basic_head_forward(x, params=params, force_pallas=True,
                             tiles=(8, 128, 128))
    out = jax.block_until_ready(out)

    ref = x @ weight.T + bias
    assert out.shape == (batch, num_classes)
    assert jnp.allclose(out, ref, atol=1e-5, rtol=1e-5)

    # 2) Automatic tile selection path (single K step, params built inline).
    out2 = basic_head_forward(x, weight, bias, force_pallas=True)
    out2 = jax.block_until_ready(out2)
    assert jnp.allclose(out2, ref, atol=1e-5, rtol=1e-5)

    print("KERNEL_OK")
</pallas_src>

<mosaic_0001>
module attributes {stable_mosaic.version = 11 : i64} {
  func.func @_linear_kernel_direct(%arg0: i32, %arg1: i32, %arg2: i32, %arg3: memref<8x128xf32, #tpu.memory_space<vmem>>, %arg4: memref<128x128xf32, #tpu.memory_space<vmem>>, %arg5: memref<1x128xf32, #tpu.memory_space<vmem>>, %arg6: memref<8x128xf32, #tpu.memory_space<vmem>>) attributes {dimension_semantics = [#tpu.dimension_semantics<parallel>, #tpu.dimension_semantics<parallel>, #tpu.dimension_semantics<arbitrary>], iteration_bounds = array<i64: 1, 1, 2>, scalar_prefetch = 0 : i64, scratch_operands = 0 : i64, tpu.core_type = #tpu.core_type<tc>, window_params = [{transform_indices = @transform_0, window_bounds = array<i64: 8, 128>}, {transform_indices = @transform_1, window_bounds = array<i64: 128, 128>}, {transform_indices = @transform_2, window_bounds = array<i64: 1, 128>}, {transform_indices = @transform_3, window_bounds = array<i64: 8, 128>}]} {
    %c0_i32 = arith.constant 0 : i32
    %0 = arith.cmpi eq, %arg2, %c0_i32 : i32
    %1 = arith.extui %0 : i1 to i32
    %c0_i32_0 = arith.constant 0 : i32
    %2 = arith.cmpi ne, %1, %c0_i32_0 : i32
    scf.if %2 {
      %c0_8 = arith.constant 0 : index
      %c0_9 = arith.constant 0 : index
      %9 = vector.load %arg5[%c0_8, %c0_9] : memref<1x128xf32, #tpu.memory_space<vmem>>, vector<1x128xf32>
      %10 = vector.shape_cast %9 : vector<1x128xf32> to vector<1x128xf32>
      %11 = vector.broadcast %10 : vector<1x128xf32> to vector<8x128xf32>
      %c0_10 = arith.constant 0 : index
      %c0_11 = arith.constant 0 : index
      %12 = vector.load %arg6[%c0_10, %c0_11] : memref<8x128xf32, #tpu.memory_space<vmem>>, vector<8x128xf32>
      tpu.vector_store %arg6[%c0_10, %c0_11], %11 {strides = array<i32>} : memref<8x128xf32, #tpu.memory_space<vmem>>, vector<8x128xf32>,
    } else {
    }
    %c0 = arith.constant 0 : index
    %c0_1 = arith.constant 0 : index
    %3 = vector.load %arg6[%c0, %c0_1] : memref<8x128xf32, #tpu.memory_space<vmem>>, vector<8x128xf32>
    %c0_2 = arith.constant 0 : index
    %c0_3 = arith.constant 0 : index
    %4 = vector.load %arg3[%c0_2, %c0_3] : memref<8x128xf32, #tpu.memory_space<vmem>>, vector<8x128xf32>
    %c0_4 = arith.constant 0 : index
    %c0_5 = arith.constant 0 : index
    %5 = vector.load %arg4[%c0_4, %c0_5] : memref<128x128xf32, #tpu.memory_space<vmem>>, vector<128x128xf32>
    %cst = arith.constant dense<0.000000e+00> : vector<8x128xf32>
    %6 = tpu.matmul %4, %5, %cst {dimension_numbers = #tpu.dot_dimension_numbers<[1], [0], [0], [1], [0, 0, 1, 1], [], []>} : vector<8x128xf32>, vector<128x128xf32>, vector<8x128xf32> -> vector<8x128xf32>
    %7 = arith.addf %3, %6 : vector<8x128xf32>
    %c0_6 = arith.constant 0 : index
    %c0_7 = arith.constant 0 : index
    %8 = vector.load %arg6[%c0_6, %c0_7] : memref<8x128xf32, #tpu.memory_space<vmem>>, vector<8x128xf32>
    tpu.vector_store %arg6[%c0_6, %c0_7], %7 {strides = array<i32>} : memref<8x128xf32, #tpu.memory_space<vmem>>, vector<8x128xf32>,
    return
  }
  func.func @transform_0(%arg0: i32, %arg1: i32, %arg2: i32) -> (i32, i32) {
    %c0_i32 = arith.constant 0 : i32
    return %arg0, %arg2 : i32, i32
  }
  func.func @transform_1(%arg0: i32, %arg1: i32, %arg2: i32) -> (i32, i32) {
    %c0_i32 = arith.constant 0 : i32
    return %arg2, %arg1 : i32, i32
  }
  func.func @transform_2(%arg0: i32, %arg1: i32, %arg2: i32) -> (i32, i32) {
    %c0_i32 = arith.constant 0 : i32
    %c0_i32_0 = arith.constant 0 : i32
    return %c0_i32, %arg1 : i32, i32
  }
  func.func @transform_3(%arg0: i32, %arg1: i32, %arg2: i32) -> (i32, i32) {
    %c0_i32 = arith.constant 0 : i32
    return %arg0, %arg1 : i32, i32
  }
}

</mosaic_0001>

<bundles_post_ra>
// kernel: tpu_custom_call.1
= control target key start
LH: loop header
LB: loop body
LE: loop exit
PB: predicated region body
PF: predicated region fallthrough
CT: control target
= control target key end

     0   :  { %8 = vsyncpa [#allocation3], 0  ;;  %s827_s0 = inlined_call_operand.hbm [shape: f32[8,256], index: 0, kind: input, shape index: {}]   ;;  %s828_s1 = inlined_call_operand.hbm [shape: f32[256,128], index: 1, kind: input, shape index: {}]   ;;  %s829_s2 = inlined_call_operand.vmem [shape: f32[1,128], index: 2, kind: input, shape index: {}]   ;;  %s830_s3 = inlined_call_operand.hbm [shape: f32[8,128], index: 3, kind: output, shape index: {}]  }
   0x1   :  { %10 = vsyncpa [#allocation3 + $0x1], 0 }
   0x2   :  { %11 = vsyncpa [#allocation6], 0 }
   0x3   :  { %13 = vsyncpa [#allocation6 + $0x1], 0 }
   0x4   :  { %14 = vsyncpa [#allocation4], 0  ;;  %s690_s12 = smov 0   ;;  %s692_s13 = smov 0  }
   0x5   :  { %s694_s14 = smov 0   ;;  %s696_s15 = smov 0  }
   0x6   :  { %s698_s16 = smov 0   ;;  %s700_s17 = smov 0  }
   0x7 LB: > { %s431_s18 = sadd.s32 4294967295, %s665_s17   ;;  %s32_s19 = sadd.s32 1, %s661_s16  ;;  %s665_s17 = sphi %s700_s17, %s20_s17   ;;  %s661_s16 = sphi %s698_s16, %s838_s16   ;;  %s657_s15 = sphi %s696_s15, %s837_s15   ;;  %s653_s14 = sphi %s694_s14, %s836_s14   ;;  %s649_s13 = sphi %s692_s13, %s835_s13   ;;  %s645_s12 = sphi %s690_s12, %s834_s12  }
   0x8   : > { %p33_p0 = scmp.ge.s32.totalorder %s32_s19, 2  ;;  %s48_s20 = sadd.s32 1, %s653_s14 }
   0x9   : > { %p55_p1 = scmp.ne.s32.totalorder %s653_s14, %s649_s13  ;;  %p56_p2 = scmp.eq.s32.totalorder %s665_s17, 0 }
   0xa   : > { %s840_s19 = smov (%p33_p0, %s32_s19), 0  ;;  %p61_p4 = scmp.ne.s32.totalorder %s649_s13, %s645_s12 }
   0xb   : > { %p726_p3 = por %p56_p2, %p55_p1  ;;  %s44_s22 = ssub.s32 %s661_s16, %s840_s19 }
   0xc   : > { %p62_p5 = scmp.eq.s32.totalorder %s431_s18, 0  ;;  %p46_p6 = scmp.eq.s32.totalorder %s44_s22, 0 }
   0xd   : > { %p464_p8 = scmp.lt.s32.totalorder %s665_s17, 2  ;;  %s744_s25 = sand.u32 1, %s653_s14  }
   0xe   : > { %p735_p7 = por %p62_p5, %p61_p4  ;;  %s436_s26 = sshll.u32 %s661_s16, 3 }
   0xf   : > { %s741_s24 = scalar_select %p46_p6, %s653_s14, %s48_s20  }
  0x10   : > { %s435_s27 = sshll.u32 %s744_s25, 3  ;;  %s183_s30 = scalar_lea.hbm %s827_s0, %s436_s26 }
  0x11   : > { %s185_s4 = sshll.u32 %s183_s30, 4  ;;  %s177_s5 = scalar_lea.vmem [#allocation2], %s435_s27  ;;  %s186_s4 = int_to_ptr.hbm [resolvable:$true] %s185_s4 }
  0x12   : > { %s187_s6 = sshll.u32 %s177_s5, 4  ;;  %p753_p9 = pnand %p464_p8, %p726_p3  ;;  %s188_s6 = int_to_ptr.vmem [resolvable:$true] %s187_s6 }
  0x13   : > { %p440_p10 = scmp.ge.s32.totalorder %s665_s17, 1  ;;  %p215_p11 = scmp.lt.s32.totalorder %s665_s17, 3 }
  0x14   : > { %s437_s8 = sshll.u32 %s744_s25, 7  ;;  %s174_s9 = scalar_lea.sflag [#allocation3], %s744_s25 }
  0x15   : > { %460 = dma.hbm_to_vmem [thread:$0]  (!%p753_p9), %s186_s4, 128, %s188_s6, %s174_s9  }
  0x16   : > { %p216_p12 = pnand %p440_p10, %p215_p11  ;;  %s448_s10 = sshll.u32 %s661_s16, 7 }
  0x17   : > { %s198_s11 = scalar_lea.vmem [#allocation5], %s437_s8  ;;  %s204_s21 = scalar_lea.hbm %s828_s1, %s448_s10 }
  0x18   : > { %s207_s12 = sshll.u32 %s198_s11, 4  ;;  %s205_s26 = sshll.u32 %s204_s21, 4  ;;  %s208_s12 = int_to_ptr.vmem [resolvable:$true] %s207_s12  ;;  %s206_s26 = int_to_ptr.hbm [resolvable:$true] %s205_s26 }
  0x19   : > { %s195_s27 = scalar_lea.sflag [#allocation6], %s744_s25  ;;  %s667_s28 = smov 128  }
  0x1a   : > { %s668_s29 = smov 8   ;;  %219 = sbr.rel (%p216_p12) target bundleno = 208 (0xd0), region = 32 }
  0x1b   : > { %463 = dma.hbm_to_vmem [thread:$0]  (!%p753_p9), %s206_s26, 2048, %s208_s12, %s195_s27, %s667_s28, %s667_s28, %s668_s29  }
  0x1c   : > { %s221_s30 = sand.u32 (!%p216_p12), 1, %s649_s13  }
  0x1d   : > { %s441_s4 = sshll.u32 (!%p216_p12), %s221_s30, 3  ;;  %s222_s5 = scalar_lea.sflag (!%p216_p12), [#allocation3], %s221_s30 }
  0x1e   : > { %s771_s6 = scalar_lea.vmem (!%p216_p12), [#allocation2], %s441_s4 }
  0x1f   : > { %632 = dma.done.wait (%p735_p7), %s222_s5, 128  }
  0x20   : > { %634 = vsyncadd (%p735_p7), %s222_s5, 4294967168  ;;  %s442_s8 = sshll.u32 %s221_s30, 7  ;;  %s232_s25 = scalar_lea.sflag [#allocation6], %s221_s30 }
  0x21   : > { %s777_s9 = scalar_lea.vmem [#allocation5], %s442_s8 }
  0x22   : > { %636 = dma.done.wait (%p735_p7), %s232_s25, 2048  }
  0x23   : > { %638 = vsyncadd (%p735_p7), %s232_s25, 4294965248  ;;  %p443_p13 = scmp.ne.s32.totalorder %s657_s15, 0 }
  0x25   : > { %269 = sbr.rel (%p443_p13) target bundleno = 44 (0x2c), region = 44 }
  0x2a   : > { %v518_v0 = vld [vmem:[%s829_s2] ss:$0 sm:$0xff] }
  0x2b   : > { %274 = vst [vmem:[#allocation7] sm:$0xff] %v518_v0 }
  0x2c PF: > { %v292_v1 = vld [vmem:[%s777_s9 + $0x78] sm:$0xff]  ;;  %v291_v2 = vld [vmem:[%s777_s9 + $0x70] sm:$0xff]  ;;  %v290_v3 = vld [vmem:[%s777_s9 + $0x68] sm:$0xff]  ;;  %s669_s15 = smov [#allocation7]   ;;  %s326_s20 = sshll.u32 %s830_s3, 4  ;;  %s327_s20 = int_to_ptr.hbm [resolvable:$true] %s326_s20 }
  0x2d   : > { %293 = vmatpush.msra.mxu0 %v292_v1  ;;  %v289_v4 = vld [vmem:[%s777_s9 + $0x60] sm:$0xff]  ;;  %v288_v5 = vld [vmem:[%s777_s9 + $0x58] sm:$0xff]  ;;  %v287_v6 = vld [vmem:[%s777_s9 + $0x50] sm:$0xff]  ;;  %s324_s23 = sshll.u32 %s669_s15, 4  ;;  %p465_p0 = scmp.eq.s32.totalorder %s431_s18, 1  ;;  %s325_s23 = int_to_ptr.vmem [resolvable:$true] %s324_s23 }
  0x2e   : > { %v286_v7 = vld [vmem:[%s777_s9 + $0x48] sm:$0xff]  ;;  %v285_v8 = vld [vmem:[%s777_s9 + $0x40] sm:$0xff]  ;;  %v284_v9 = vld [vmem:[%s777_s9 + $0x38] sm:$0xff] }
  0x2f   : > { %294 = vmatpush.msra.mxu0 %v291_v2  ;;  %v283_v10 = vld [vmem:[%s777_s9 + $0x30] sm:$0xff]  ;;  %v282_v11 = vld [vmem:[%s777_s9 + $0x28] sm:$0xff]  ;;  %v281_v12 = vld [vmem:[%s777_s9 + $0x20] sm:$0xff] }
  0x30   : > { %v280_v13 = vld [vmem:[%s777_s9 + $0x18] sm:$0xff]  ;;  %v279_v14 = vld [vmem:[%s777_s9 + $0x10] sm:$0xff]  ;;  %v278_v15 = vld [vmem:[%s777_s9 + $0x8] sm:$0xff] }
  0x31   : > { %295 = vmatpush.msra.mxu0 %v290_v3  ;;  %v277_v16 = vld [vmem:[%s777_s9] sm:$0xff]  ;;  %v276_v17 = vld [vmem:[%s771_s6] sm:$0xff] }
  0x32   : > { %v275_v18 = vld [vmem:[#allocation7] sm:$0xff] }
  0x33   : > { %296 = vmatpush.msra.mxu0 %v289_v4 }
  0x35   : > { %297 = vmatpush.msra.mxu0 %v288_v5 }
  0x37   : > { %298 = vmatpush.msra.mxu0 %v287_v6 }
  0x39   : > { %299 = vmatpush.msra.mxu0 %v286_v7 }
  0x3b   : > { %300 = vmatpush.msra.mxu0 %v285_v8 }
  0x3d   : > { %301 = vmatpush.msra.mxu0 %v284_v9 }
  0x3f   : > { %302 = vmatpush.msra.mxu0 %v283_v10 }
  0x41   : > { %303 = vmatpush.msra.mxu0 %v282_v11 }
  0x43   : > { %304 = vmatpush.msra.mxu0 %v281_v12 }
  0x45   : > { %305 = vmatpush.msra.mxu0 %v280_v13 }
  0x47   : > { %306 = vmatpush.msra.mxu0 %v279_v14 }
  0x49   : > { %307 = vmatpush.msra.mxu0 %v278_v15 }
  0x4b   : > { %308 = vmatpush.msra.mxu0 %v277_v16 }
  0x4c   : > { %309 = vmatmul.f32.vlgmr.msra.gmra.mxu0 %v276_v17 }
  0xc9   : > { %v310_v19 = vpop.f32.mrf.mxu0 }
  0xca   : > { %v313_v20 = vadd.f32 %v310_v19, %v275_v18 }
  0xcc   : > { %314 = vst [vmem:[#allocation7] sm:$0xff] %v313_v20 }
  0xcd   : > { %454 = dma.vmem_to_hbm [thread:$0]  (%p465_p0), %s325_s23, 128, %s327_s20, [#allocation4]  }
  0xce   : > { %640 = dma.done.wait (%p465_p0), [#allocation4], 128  }
  0xcf   : > { %642 = vsyncadd (%p465_p0), [#allocation4], 4294967168 }
  0xd0 PF: > { %s20_s17 = sadd.s32 1, %s665_s17   ;;  %s834_s12 = smov %s649_s13 }
  0xd1   : > { %p17_p1 = scmp.ge.s32.totalorder %s20_s17, 4   ;;  %s835_s13 = smov %s653_s14 }
  0xd2   : > { %s836_s14 = smov %s741_s24  ;;  %s837_s15 = smov %s661_s16 }
  0xd3   : > { %s838_s16 = smov %s840_s19  ;;  %19 = sbr.rel (!%p17_p1) target bundleno = 7 (0x7), region = 90 }
  0xd8   :  { %340 = vsyncpa [#allocation3], 1 }
  0xd9   :  { %342 = vsyncpa [#allocation3 + $0x1], 1 }
  0xda   :  { %343 = vsyncpa [#allocation6], 1 }
  0xdb   :  { %345 = vsyncpa [#allocation6 + $0x1], 1 }
  0xdc   :  { %346 = vsyncpa [#allocation4], 1 }
  0xdd   :  { %348 = vsyncpa [#allocation4 + $0x1], 1 }

</bundles_post_ra>
